<compile_context>
chip_gen: v5e
topology: v5e:2x2
jax: 0.10.0
libtpu: 0.0.40
codegen_flags: <defaults>
</compile_context>

<pallas_src>
import jax
import jax.numpy as jnp
from jax.experimental import pallas as pl
from jax.experimental.pallas import tpu as pltpu

_LANES = 128
_ACC_ROWS = 8                       # one f32 vreg of sublanes per partial accumulator
_VMEM_CAP = 56 * 1024 * 1024        # stay under v7x's 64 MiB physical VMEM per TC


def _round_up(x, m):
    return ((x + m - 1) // m) * m


def _sublane_align(*dtypes):
    """Sublane multiple required by the narrowest input dtype (8/16/32)."""
    min_itemsize = min(jnp.dtype(d).itemsize for d in dtypes)
    return max(8, 32 // max(1, min_itemsize))


def _make_dice_kernel(rows, rows_tile, num_chunks, chunks_per_split):
    groups = rows_tile // _ACC_ROWS

    def kernel(o_ref, t_ref, inter_ref, denom_ref):
        c = pl.program_id(0)            # reduction core-split index
        k = pl.program_id(2)            # per-split feature-chunk index
        gk = c * chunks_per_split + k   # global feature-chunk index

        @pl.when(k == 0)
        def _init():
            inter_ref[...] = jnp.zeros_like(inter_ref)
            denom_ref[...] = jnp.zeros_like(denom_ref)

        # f32 accumulation regardless of input dtype (torch.FloatTensor cast).
        o = o_ref[0].astype(jnp.float32).reshape(groups, _ACC_ROWS, _LANES)
        t = t_ref[0].astype(jnp.float32).reshape(groups, _ACC_ROWS, _LANES)

        def accumulate(o_blk, t_blk):
            # Reduce only the vreg-group axis (plain VPU adds, no XLU sublane
            # reduce); sublane + lane reductions are deferred to the epilogue.
            # denom uses sum(o) + sum(t) to avoid an o+t block-sized temporary.
            inter_ref[...] += jnp.sum(o_blk * t_blk, axis=0)[None, None]
            denom_ref[...] += (jnp.sum(o_blk, axis=0)
                               + jnp.sum(t_blk, axis=0))[None, None]

        @pl.when(gk < num_chunks - 1)
        def _full_chunk():
            accumulate(o, t)

        @pl.when(gk >= num_chunks - 1)
        def _tail_chunk():
            # Rows >= `rows` are either Pallas edge-block padding (contents
            # undefined) or an overflow chunk of an uneven core split: zero
            # them explicitly before accumulating.
            shape = (groups, _ACC_ROWS, _LANES)
            row = (gk * rows_tile
                   + jax.lax.broadcasted_iota(jnp.int32, shape, 0) * _ACC_ROWS
                   + jax.lax.broadcasted_iota(jnp.int32, shape, 1))
            valid = row < rows
            accumulate(jnp.where(valid, o, 0.0), jnp.where(valid, t, 0.0))

    return kernel


def dice_loss(outputs, targets, epsilon=1e-5, target_block_bytes=6 * 1024 * 1024):
    """mean(1 - dice_score), matching the PyTorch DiceLoss forward.

    Inputs may be any dtype (f32 / bf16 / int8 / bool); accumulation is f32.
    """
    B = targets.shape[0]
    o2 = outputs.reshape(B, -1)
    t2 = targets.reshape(B, -1)
    if o2.shape != t2.shape:
        raise ValueError(f"shape mismatch: {o2.shape} vs {t2.shape}")
    N = o2.shape[1]

    # Lane-dense (B, rows, 128) view. Only a <=127-element lane pad when
    # N % 128 != 0 (skipped when aligned); NO full rows-padding copy -- the
    # ragged row tail is handled in-kernel.
    rows = pl.cdiv(N, _LANES)
    pad = rows * _LANES - N
    if pad:
        o2 = jnp.pad(o2, ((0, 0), (0, pad)))
        t2 = jnp.pad(t2, ((0, 0), (0, pad)))
    o3 = o2.reshape(B, rows, _LANES)
    t3 = t2.reshape(B, rows, _LANES)

    io, it = o3.dtype.itemsize, t3.dtype.itemsize
    sub = _sublane_align(o3.dtype, t3.dtype)

    # Rows per block: ~target_block_bytes of f32 footprint, clamped so that
    # double-buffered native-dtype inputs + worst-case f32 temporaries fit
    # comfortably below the VMEM cap on every generation.
    bytes_per_row = _LANES * (2 * (io + it) + 4 * 4)
    rows_user = max(sub, (target_block_bytes // (_LANES * 4)) // sub * sub)
    rows_vmem = max(sub, ((_VMEM_CAP - (4 << 20)) // bytes_per_row) // sub * sub)
    rows_tile = min(rows_user, rows_vmem, _round_up(rows, sub))
    num_chunks = pl.cdiv(rows, rows_tile)

    # Split the feature-chunk reduction 2-way when the batch alone cannot keep
    # both v7x TensorCores busy (odd / unit batch). Harmless on 1-TC chips.
    n_split = 2 if (B % 2 == 1 and num_chunks >= 2) else 1
    chunks_per_split = pl.cdiv(num_chunks, n_split)

    vmem_limit = int(min(_VMEM_CAP,
                         max(32 << 20, rows_tile * bytes_per_row + (4 << 20))))

    kernel = _make_dice_kernel(rows, rows_tile, num_chunks, chunks_per_split)

    def in_index_map(c, b, k):
        # Clamp overflow chunks of an uneven split onto a valid block; the
        # kernel masks all of their rows to zero, so they contribute nothing.
        return (b, jnp.minimum(c * chunks_per_split + k, num_chunks - 1), 0)

    out_spec = pl.BlockSpec((1, 1, _ACC_ROWS, _LANES), lambda c, b, k: (c, b, 0, 0))
    acc_shape = jax.ShapeDtypeStruct((n_split, B, _ACC_ROWS, _LANES), jnp.float32)

    cost = pl.CostEstimate(
        flops=3 * B * rows * _LANES,
        transcendentals=0,
        bytes_accessed=(o3.size * io + t3.size * it
                        + 2 * n_split * B * _ACC_ROWS * _LANES * 4),
    )

    inter, denom = pl.pallas_call(
        kernel,
        out_shape=(acc_shape, acc_shape),
        grid_spec=pltpu.PrefetchScalarGridSpec(
            num_scalar_prefetch=0,
            grid=(n_split, B, chunks_per_split),
            in_specs=[
                pl.BlockSpec((1, rows_tile, _LANES), in_index_map),
                pl.BlockSpec((1, rows_tile, _LANES), in_index_map),
            ],
            out_specs=[out_spec, out_spec],
        ),
        compiler_params=pltpu.CompilerParams(
            dimension_semantics=("parallel", "parallel", "arbitrary"),
            vmem_limit_bytes=vmem_limit,
        ),
        cost_estimate=cost,
    )(o3, t3)

    # Tiny epilogue: fold core-split / sublane / lane partials, then the loss.
    inter_s = jnp.sum(inter, axis=(0, 2, 3))
    denom_s = jnp.sum(denom, axis=(0, 2, 3))
    dice = (2.0 * inter_s + epsilon) / (denom_s + epsilon)
    return jnp.mean(1.0 - dice)


def _reference(outputs, targets, epsilon=1e-5):
    B = targets.shape[0]
    o = outputs.reshape(B, -1).astype(jnp.float32)
    t = targets.reshape(B, -1).astype(jnp.float32)
    inter = jnp.sum(o * t, axis=-1)
    dice = (2.0 * inter + epsilon) / (jnp.sum(o + t, axis=-1) + epsilon)
    return jnp.mean(1.0 - dice)


if __name__ == "__main__":
    key = jax.random.PRNGKey(0)
    k1, k2, k3, k4, k5, k6 = jax.random.split(key, 6)

    # Case 1: shapes implied by the module (B, C, H, W), lane-aligned features.
    B, C, H, W = 2, 4, 16, 16
    outputs = jax.nn.sigmoid(jax.random.normal(k1, (B, C, H, W), jnp.float32))
    targets = (jax.random.uniform(k2, (B, C, H, W)) > 0.5).astype(jnp.float32)
    loss = jax.block_until_ready(dice_loss(outputs, targets))
    ref = _reference(outputs, targets)
    assert jnp.allclose(loss, ref, atol=1e-5, rtol=1e-4), (loss, ref)

    # Case 2: ragged feature count (N % 128 != 0) + odd batch -> exercises the
    # <=127-element lane pad and the in-kernel tail row mask.
    o_b = jax.nn.sigmoid(jax.random.normal(k3, (3, 3, 7, 11), jnp.float32))
    t_b = (jax.random.uniform(k4, (3, 3, 7, 11)) > 0.5).astype(jnp.float32)
    loss_b = jax.block_until_ready(dice_loss(o_b, t_b))
    ref_b = _reference(o_b, t_b)
    assert jnp.allclose(loss_b, ref_b, atol=1e-5, rtol=1e-4), (loss_b, ref_b)

    # Case 3: batch 1 with several feature chunks (tiny block budget) ->
    # exercises chunked accumulation + the 2-way core split with overflow mask.
    o_c = jax.nn.sigmoid(jax.random.normal(k5, (1, 8, 32, 48), jnp.float32))
    t_c = (jax.random.uniform(k6, (1, 8, 32, 48)) > 0.5).astype(jnp.float32)
    loss_c = jax.block_until_ready(dice_loss(o_c, t_c, target_block_bytes=16 * 1024))
    ref_c = _reference(o_c, t_c)
    assert jnp.allclose(loss_c, ref_c, atol=1e-5, rtol=1e-4), (loss_c, ref_c)

    print("KERNEL_OK")
</pallas_src>

<mosaic_0001>
module attributes {stable_mosaic.version = 11 : i64} {
  func.func @kernel(%arg0: i32, %arg1: i32, %arg2: i32, %arg3: memref<1x8x128xf32, #tpu.memory_space<vmem>>, %arg4: memref<1x8x128xf32, #tpu.memory_space<vmem>>, %arg5: memref<1x1x8x128xf32, #tpu.memory_space<vmem>>, %arg6: memref<1x1x8x128xf32, #tpu.memory_space<vmem>>) attributes {dimension_semantics = [#tpu.dimension_semantics<parallel>, #tpu.dimension_semantics<parallel>, #tpu.dimension_semantics<arbitrary>], iteration_bounds = array<i64: 1, 2, 1>, scalar_prefetch = 0 : i64, scratch_operands = 0 : i64, tpu.core_type = #tpu.core_type<tc>, window_params = [{transform_indices = @transform_0, window_bounds = array<i64: 1, 8, 128>}, {transform_indices = @transform_1, window_bounds = array<i64: 1, 8, 128>}, {transform_indices = @transform_2, window_bounds = array<i64: 1, 1, 8, 128>}, {transform_indices = @transform_3, window_bounds = array<i64: 1, 1, 8, 128>}]} {
    %c1_i32 = arith.constant 1 : i32
    %0 = arith.muli %arg0, %c1_i32 : i32
    %1 = arith.addi %0, %arg2 : i32
    %c0_i32 = arith.constant 0 : i32
    %2 = arith.cmpi eq, %arg2, %c0_i32 : i32
    %3 = arith.extui %2 : i1 to i32
    %c0_i32_0 = arith.constant 0 : i32
    %4 = arith.cmpi ne, %3, %c0_i32_0 : i32
    scf.if %4 {
      %cst = arith.constant 0.000000e+00 : f32
      %17 = vector.broadcast %cst : f32 to vector<1x1x8x128xf32>
      %c0_10 = arith.constant 0 : index
      %c0_11 = arith.constant 0 : index
      %c0_12 = arith.constant 0 : index
      %c0_13 = arith.constant 0 : index
      %18 = vector.load %arg5[%c0_10, %c0_11, %c0_12, %c0_13] : memref<1x1x8x128xf32, #tpu.memory_space<vmem>>, vector<1x1x8x128xf32>
      tpu.vector_store %arg5[%c0_10, %c0_11, %c0_12, %c0_13], %17 {strides = array<i32>} : memref<1x1x8x128xf32, #tpu.memory_space<vmem>>, vector<1x1x8x128xf32>,
      %cst_14 = arith.constant 0.000000e+00 : f32
      %19 = vector.broadcast %cst_14 : f32 to vector<1x1x8x128xf32>
      %c0_15 = arith.constant 0 : index
      %c0_16 = arith.constant 0 : index
      %c0_17 = arith.constant 0 : index
      %c0_18 = arith.constant 0 : index
      %20 = vector.load %arg6[%c0_15, %c0_16, %c0_17, %c0_18] : memref<1x1x8x128xf32, #tpu.memory_space<vmem>>, vector<1x1x8x128xf32>
      tpu.vector_store %arg6[%c0_15, %c0_16, %c0_17, %c0_18], %19 {strides = array<i32>} : memref<1x1x8x128xf32, #tpu.memory_space<vmem>>, vector<1x1x8x128xf32>,
    } else {
    }
    %c0 = arith.constant 0 : index
    %c0_1 = arith.constant 0 : index
    %c0_2 = arith.constant 0 : index
    %5 = vector.load %arg3[%c0, %c0_1, %c0_2] : memref<1x8x128xf32, #tpu.memory_space<vmem>>, vector<1x8x128xf32>
    %6 = vector.shape_cast %5 : vector<1x8x128xf32> to vector<8x128xf32>
    %7 = vector.shape_cast %6 : vector<8x128xf32> to vector<1x8x128xf32>
    %c0_3 = arith.constant 0 : index
    %c0_4 = arith.constant 0 : index
    %c0_5 = arith.constant 0 : index
    %8 = vector.load %arg4[%c0_3, %c0_4, %c0_5] : memref<1x8x128xf32, #tpu.memory_space<vmem>>, vector<1x8x128xf32>
    %9 = vector.shape_cast %8 : vector<1x8x128xf32> to vector<8x128xf32>
    %10 = vector.shape_cast %9 : vector<8x128xf32> to vector<1x8x128xf32>
    %c0_i32_6 = arith.constant 0 : i32
    %11 = arith.cmpi slt, %1, %c0_i32_6 : i32
    %12 = arith.extui %11 : i1 to i32
    %c0_i32_7 = arith.constant 0 : i32
    %13 = arith.cmpi ne, %12, %c0_i32_7 : i32
    scf.if %13 {
      %c0_10 = arith.constant 0 : index
      %c0_11 = arith.constant 0 : index
      %c0_12 = arith.constant 0 : index
      %c0_13 = arith.constant 0 : index
      %17 = vector.load %arg5[%c0_10, %c0_11, %c0_12, %c0_13] : memref<1x1x8x128xf32, #tpu.memory_space<vmem>>, vector<1x1x8x128xf32>
      %18 = arith.mulf %7, %10 : vector<1x8x128xf32>
      %cst = arith.constant dense<0.000000e+00> : vector<8x128xf32>
      %19 = vector.multi_reduction <add>, %18, %cst [0] : vector<1x8x128xf32> to vector<8x128xf32>
      %20 = vector.shape_cast %19 : vector<8x128xf32> to vector<1x1x8x128xf32>
      %21 = arith.addf %17, %20 : vector<1x1x8x128xf32>
      %c0_14 = arith.constant 0 : index
      %c0_15 = arith.constant 0 : index
      %c0_16 = arith.constant 0 : index
      %c0_17 = arith.constant 0 : index
      %22 = vector.load %arg5[%c0_14, %c0_15, %c0_16, %c0_17] : memref<1x1x8x128xf32, #tpu.memory_space<vmem>>, vector<1x1x8x128xf32>
      tpu.vector_store %arg5[%c0_14, %c0_15, %c0_16, %c0_17], %21 {strides = array<i32>} : memref<1x1x8x128xf32, #tpu.memory_space<vmem>>, vector<1x1x8x128xf32>,
      %c0_18 = arith.constant 0 : index
      %c0_19 = arith.constant 0 : index
      %c0_20 = arith.constant 0 : index
      %c0_21 = arith.constant 0 : index
      %23 = vector.load %arg6[%c0_18, %c0_19, %c0_20, %c0_21] : memref<1x1x8x128xf32, #tpu.memory_space<vmem>>, vector<1x1x8x128xf32>
      %cst_22 = arith.constant dense<0.000000e+00> : vector<8x128xf32>
      %24 = vector.multi_reduction <add>, %7, %cst_22 [0] : vector<1x8x128xf32> to vector<8x128xf32>
      %cst_23 = arith.constant dense<0.000000e+00> : vector<8x128xf32>
      %25 = vector.multi_reduction <add>, %10, %cst_23 [0] : vector<1x8x128xf32> to vector<8x128xf32>
      %26 = arith.addf %24, %25 : vector<8x128xf32>
      %27 = vector.shape_cast %26 : vector<8x128xf32> to vector<1x1x8x128xf32>
      %28 = arith.addf %23, %27 : vector<1x1x8x128xf32>
      %c0_24 = arith.constant 0 : index
      %c0_25 = arith.constant 0 : index
      %c0_26 = arith.constant 0 : index
      %c0_27 = arith.constant 0 : index
      %29 = vector.load %arg6[%c0_24, %c0_25, %c0_26, %c0_27] : memref<1x1x8x128xf32, #tpu.memory_space<vmem>>, vector<1x1x8x128xf32>
      tpu.vector_store %arg6[%c0_24, %c0_25, %c0_26, %c0_27], %28 {strides = array<i32>} : memref<1x1x8x128xf32, #tpu.memory_space<vmem>>, vector<1x1x8x128xf32>,
    } else {
    }
    %c0_i32_8 = arith.constant 0 : i32
    %14 = arith.cmpi sge, %1, %c0_i32_8 : i32
    %15 = arith.extui %14 : i1 to i32
    %c0_i32_9 = arith.constant 0 : i32
    %16 = arith.cmpi ne, %15, %c0_i32_9 : i32
    scf.if %16 {
      %c8_i32 = arith.constant 8 : i32
      %17 = arith.muli %1, %c8_i32 : i32
      %18 = tpu.iota {dimensions = array<i32: 0>} : vector<1x8x128xi32>
      %c8_i32_10 = arith.constant 8 : i32
      %19 = vector.broadcast %c8_i32_10 : i32 to vector<1x8x128xi32>
      %20 = arith.muli %18, %19 : vector<1x8x128xi32>
      %21 = vector.broadcast %17 : i32 to vector<1x8x128xi32>
      %22 = arith.addi %21, %20 : vector<1x8x128xi32>
      %23 = tpu.iota {dimensions = array<i32: 1>} : vector<1x8x128xi32>
      %24 = arith.addi %22, %23 : vector<1x8x128xi32>
      %c8_i32_11 = arith.constant 8 : i32
      %25 = vector.broadcast %c8_i32_11 : i32 to vector<1x8x128xi32>
      %26 = arith.cmpi slt, %24, %25 : vector<1x8x128xi32>
      %cst = arith.constant 0.000000e+00 : f32
      %27 = vector.broadcast %cst : f32 to vector<1x8x128xf32>
      %28 = arith.select %26, %7, %27 : vector<1x8x128xi1>, vector<1x8x128xf32>
      %cst_12 = arith.constant 0.000000e+00 : f32
      %29 = vector.broadcast %cst_12 : f32 to vector<1x8x128xf32>
      %30 = arith.select %26, %10, %29 : vector<1x8x128xi1>, vector<1x8x128xf32>
      %c0_13 = arith.constant 0 : index
      %c0_14 = arith.constant 0 : index
      %c0_15 = arith.constant 0 : index
      %c0_16 = arith.constant 0 : index
      %31 = vector.load %arg5[%c0_13, %c0_14, %c0_15, %c0_16] : memref<1x1x8x128xf32, #tpu.memory_space<vmem>>, vector<1x1x8x128xf32>
      %32 = arith.mulf %28, %30 : vector<1x8x128xf32>
      %cst_17 = arith.constant dense<0.000000e+00> : vector<8x128xf32>
      %33 = vector.multi_reduction <add>, %32, %cst_17 [0] : vector<1x8x128xf32> to vector<8x128xf32>
      %34 = vector.shape_cast %33 : vector<8x128xf32> to vector<1x1x8x128xf32>
      %35 = arith.addf %31, %34 : vector<1x1x8x128xf32>
      %c0_18 = arith.constant 0 : index
      %c0_19 = arith.constant 0 : index
      %c0_20 = arith.constant 0 : index
      %c0_21 = arith.constant 0 : index
      %36 = vector.load %arg5[%c0_18, %c0_19, %c0_20, %c0_21] : memref<1x1x8x128xf32, #tpu.memory_space<vmem>>, vector<1x1x8x128xf32>
      tpu.vector_store %arg5[%c0_18, %c0_19, %c0_20, %c0_21], %35 {strides = array<i32>} : memref<1x1x8x128xf32, #tpu.memory_space<vmem>>, vector<1x1x8x128xf32>,
      %c0_22 = arith.constant 0 : index
      %c0_23 = arith.constant 0 : index
      %c0_24 = arith.constant 0 : index
      %c0_25 = arith.constant 0 : index
      %37 = vector.load %arg6[%c0_22, %c0_23, %c0_24, %c0_25] : memref<1x1x8x128xf32, #tpu.memory_space<vmem>>, vector<1x1x8x128xf32>
      %cst_26 = arith.constant dense<0.000000e+00> : vector<8x128xf32>
      %38 = vector.multi_reduction <add>, %28, %cst_26 [0] : vector<1x8x128xf32> to vector<8x128xf32>
      %cst_27 = arith.constant dense<0.000000e+00> : vector<8x128xf32>
      %39 = vector.multi_reduction <add>, %30, %cst_27 [0] : vector<1x8x128xf32> to vector<8x128xf32>
      %40 = arith.addf %38, %39 : vector<8x128xf32>
      %41 = vector.shape_cast %40 : vector<8x128xf32> to vector<1x1x8x128xf32>
      %42 = arith.addf %37, %41 : vector<1x1x8x128xf32>
      %c0_28 = arith.constant 0 : index
      %c0_29 = arith.constant 0 : index
      %c0_30 = arith.constant 0 : index
      %c0_31 = arith.constant 0 : index
      %43 = vector.load %arg6[%c0_28, %c0_29, %c0_30, %c0_31] : memref<1x1x8x128xf32, #tpu.memory_space<vmem>>, vector<1x1x8x128xf32>
      tpu.vector_store %arg6[%c0_28, %c0_29, %c0_30, %c0_31], %42 {strides = array<i32>} : memref<1x1x8x128xf32, #tpu.memory_space<vmem>>, vector<1x1x8x128xf32>,
    } else {
    }
    return
  }
  func.func @transform_0(%arg0: i32, %arg1: i32, %arg2: i32) -> (i32, i32, i32) {
    %c1_i32 = arith.constant 1 : i32
    %0 = arith.muli %arg0, %c1_i32 : i32
    %1 = arith.addi %0, %arg2 : i32
    %c0_i32 = arith.constant 0 : i32
    %2 = arith.minsi %1, %c0_i32 : i32
    %c0_i32_0 = arith.constant 0 : i32
    %c0_i32_1 = arith.constant 0 : i32
    return %arg1, %2, %c0_i32_0 : i32, i32, i32
  }
  func.func @transform_1(%arg0: i32, %arg1: i32, %arg2: i32) -> (i32, i32, i32) {
    %c1_i32 = arith.constant 1 : i32
    %0 = arith.muli %arg0, %c1_i32 : i32
    %1 = arith.addi %0, %arg2 : i32
    %c0_i32 = arith.constant 0 : i32
    %2 = arith.minsi %1, %c0_i32 : i32
    %c0_i32_0 = arith.constant 0 : i32
    %c0_i32_1 = arith.constant 0 : i32
    return %arg1, %2, %c0_i32_0 : i32, i32, i32
  }
  func.func @transform_2(%arg0: i32, %arg1: i32, %arg2: i32) -> (i32, i32, i32, i32) {
    %c0_i32 = arith.constant 0 : i32
    %c0_i32_0 = arith.constant 0 : i32
    %c0_i32_1 = arith.constant 0 : i32
    return %arg0, %arg1, %c0_i32, %c0_i32_0 : i32, i32, i32, i32
  }
  func.func @transform_3(%arg0: i32, %arg1: i32, %arg2: i32) -> (i32, i32, i32, i32) {
    %c0_i32 = arith.constant 0 : i32
    %c0_i32_0 = arith.constant 0 : i32
    %c0_i32_1 = arith.constant 0 : i32
    return %arg0, %arg1, %c0_i32, %c0_i32_0 : i32, i32, i32, i32
  }
}

</mosaic_0001>

<bundles_post_ra>
// kernel: tpu_custom_call.1
= control target key start
LH: loop header
LB: loop body
LE: loop exit
PB: predicated region body
PF: predicated region fallthrough
CT: control target
= control target key end

     0   :  { %9 = vsyncpa [#allocation3], 0  ;;  %s966_s0 = inlined_call_operand.hbm [shape: f32[2,8,128], index: 0, kind: input, shape index: {}]   ;;  %s967_s1 = inlined_call_operand.hbm [shape: f32[2,8,128], index: 1, kind: input, shape index: {}]   ;;  %s968_s2 = inlined_call_operand.hbm [shape: f32[1,2,8,128], index: 2, kind: output, shape index: {0}]   ;;  %s969_s3 = inlined_call_operand.hbm [shape: f32[1,2,8,128], index: 3, kind: output, shape index: {1}]  }
   0x1   :  { %11 = vsyncpa [#allocation3 + $0x1], 0 }
   0x2   :  { %12 = vsyncpa [#allocation6], 0 }
   0x3   :  { %14 = vsyncpa [#allocation6 + $0x1], 0 }
   0x4   :  { %15 = vsyncpa [#allocation4], 0 }
   0x5   :  { %17 = vsyncpa [#allocation4 + $0x1], 0 }
   0x6   :  { %18 = vsyncpa [#allocation9], 0 }
   0x7   :  { %20 = vsyncpa [#allocation9 + $0x1], 0  ;;  %s812_s12 = smov 0   ;;  %s814_s13 = smov 0  }
   0x8   :  { %s816_s14 = smov 0   ;;  %s818_s15 = smov 0  }
   0x9   :  { %s820_s16 = smov 0   ;;  %s822_s17 = smov 0  }
   0xa LB: > { %s520_s18 = sadd.s32 4294967295, %s790_s17   ;;  %s521_s19 = sadd.s32 4294967294, %s790_s17   ;;  %s790_s17 = sphi %s822_s17, %s26_s17   ;;  %s786_s16 = sphi %s820_s16, %s978_s16   ;;  %s782_s15 = sphi %s818_s15, %s977_s15   ;;  %s778_s14 = sphi %s816_s14, %s976_s14   ;;  %s774_s13 = sphi %s814_s13, %s975_s13   ;;  %s770_s12 = sphi %s812_s12, %s974_s12  }
   0xb   : > { %s41_s20 = sadd.s32 1, %s786_s16  ;;  %s60_s21 = sadd.s32 1, %s778_s14 }
   0xc   : > { %p43_p0 = scmp.ge.s32.totalorder %s41_s20, 2  ;;  %p67_p1 = scmp.ne.s32.totalorder %s778_s14, %s774_s13 }
   0xd   : > { %p68_p2 = scmp.eq.s32.totalorder %s790_s17, 0  ;;  %p73_p3 = scmp.ne.s32.totalorder %s774_s13, %s770_s12 }
   0xe   : > { %s980_s20 = smov (%p43_p0, %s41_s20), 0  ;;  %p74_p5 = scmp.eq.s32.totalorder %s520_s18, 0 }
   0xf   : > { %p853_p4 = por %p68_p2, %p67_p1  ;;  %s55_s23 = ssub.s32 %s786_s16, %s980_s20 }
  0x10   : > { %p133_p6 = scmp.eq.s32.totalorder %s520_s18, 1  ;;  %p58_p7 = scmp.eq.s32.totalorder %s55_s23, 0 }
  0x11   : > { %p859_p8 = por %p74_p5, %p73_p3  ;;  %p139_p10 = scmp.eq.s32.totalorder %s521_s19, 1 }
  0x12   : > { %p863_p9 = por %p133_p6, %p67_p1  ;;  %p523_p12 = scmp.ge.s32.totalorder %s790_s17, 2 }
  0x13   : > { %s868_s26 = scalar_select %p58_p7, %s778_s14, %s60_s21  }
  0x14   : > { %p870_p11 = por %p139_p10, %p73_p3  ;;  %p561_p13 = scmp.lt.s32.totalorder %s790_s17, 2 }
  0x15   : > { %s187_s28 = sand.u32 1, %s778_s14   ;;  %s525_s30 = sshll.u32 %s786_s16, 3 }
  0x16   : > { %s524_s29 = sshll.u32 %s187_s28, 3  ;;  %s199_s6 = scalar_lea.hbm %s966_s0, %s525_s30 }
  0x17   : > { %s191_s7 = scalar_lea.vmem [#allocation2], %s524_s29  ;;  %s201_s9 = sshll.u32 %s199_s6, 4  ;;  %s202_s9 = int_to_ptr.hbm [resolvable:$true] %s201_s9 }
  0x18   : > { %s203_s8 = sshll.u32 %s191_s7, 4  ;;  %p548_p0 = pnand %p561_p13, %p853_p4  ;;  %s204_s8 = int_to_ptr.vmem [resolvable:$true] %s203_s8 }
  0x19   : > { %p528_p1 = scmp.ge.s32.totalorder %s790_s17, 1  ;;  %p231_p2 = scmp.lt.s32.totalorder %s790_s17, 3 }
  0x1a   : > { %s188_s10 = scalar_lea.sflag [#allocation3], %s187_s28  ;;  %s222_s19 = scalar_lea.hbm %s967_s1, %s525_s30 }
  0x1b   : > { %550 = dma.hbm_to_vmem [thread:$0]  (!%p548_p0), %s202_s9, 128, %s204_s8, %s188_s10  }
  0x1c   : > { %p232_p3 = pnand %p528_p1, %p231_p2  ;;  %s214_s21 = scalar_lea.vmem [#allocation5], %s524_s29 }
  0x1d   : > { %s226_s23 = sshll.u32 %s214_s21, 4  ;;  %s224_s4 = sshll.u32 %s222_s19, 4  ;;  %s227_s23 = int_to_ptr.vmem [resolvable:$true] %s226_s23  ;;  %s225_s4 = int_to_ptr.hbm [resolvable:$true] %s224_s4 }
  0x1e   : > { %s211_s5 = scalar_lea.sflag [#allocation6], %s187_s28  ;;  %235 = sbr.rel (%p232_p3) target bundleno = 67 (0x43), region = 28 }
  0x1f   : > { %553 = dma.hbm_to_vmem [thread:$0]  (!%p548_p0), %s225_s4, 128, %s227_s23, %s211_s5  }
  0x20   : > { %s889_s22 = sand.u32 (!%p232_p3), 1, %s774_s13  }
  0x21   : > { %s529_s6 = sshll.u32 (!%p232_p3), %s889_s22, 3  ;;  %s238_s7 = scalar_lea.sflag (!%p232_p3), [#allocation3], %s889_s22 }
  0x22   : > { %s241_s8 = scalar_lea.vmem (!%p232_p3), [#allocation2], %s529_s6 }
  0x23   : > { %753 = dma.done.wait (%p859_p8), %s238_s7, 128  }
  0x24   : > { %755 = vsyncadd (%p859_p8), %s238_s7, 4294967168  ;;  %s248_s29 = scalar_lea.sflag [#allocation6], %s889_s22  ;;  %s251_s28 = scalar_lea.vmem [#allocation5], %s529_s6 }
  0x25   : > { %757 = dma.done.wait (%p859_p8), %s248_s29, 128  }
  0x26   : > { %759 = vsyncadd (%p859_p8), %s248_s29, 4294967168  ;;  %s535_s30 = sshll.u32 %s782_s15, 3  ;;  %s277_s23 = scalar_lea.vmem [#allocation7], %s529_s6  ;;  %v298_v0 = vld [vmem:[%s241_s8] sm:$0xff]  ;;  %v299_v1 = vld [vmem:[%s251_s28] sm:$0xff] }
  0x27   : > { %s356_s11 = scalar_lea.hbm %s968_s2, %s535_s30  ;;  %s372_s21 = scalar_lea.hbm %s969_s3, %s535_s30  ;;  %v328_v2 = vmul.f32 %v299_v1, %v298_v0  ;;  %v335_v3 = vadd.f32 %v299_v1, %v298_v0 }
  0x28   : > { %s909_s4 = sshll.u32 %s277_s23, 4  ;;  %s360_s5 = sshll.u32 %s356_s11, 4  ;;  %s359_s4 = int_to_ptr.vmem [resolvable:$true] %s909_s4  ;;  %s361_s5 = int_to_ptr.hbm [resolvable:$true] %s360_s5 }
  0x29   : > { %s284_s15 = scalar_lea.vmem [#allocation8], %s529_s6  ;;  %s376_s7 = sshll.u32 %s372_s21, 4  ;;  %331 = vst [vmem:[%s277_s23] sm:$0xff] %v328_v2  ;;  %s915_s7 = int_to_ptr.hbm [resolvable:$true] %s376_s7 }
  0x2a   : > { %s911_s24 = sshll.u32 %s284_s15, 4  ;;  %337 = vst [vmem:[%s284_s15] sm:$0xff] %v335_v3  ;;  %s339_s29 = scalar_lea.sflag [#allocation4], %s889_s22  ;;  %s375_s24 = int_to_ptr.vmem [resolvable:$true] %s911_s24 }
  0x2b   : > { %s686_s30 = sshra.s32 %s361_s5, 4  ;;  %s692_s9 = scalar_lea.hbm %s968_s2, 16  ;;  %s687_s30 = int_to_ptr.hbm [resolvable:$true] %s686_s30 }
  0x2c   : > { %s688_s8 = scalar_lea.hbm %s687_s30, 8  ;;  %p693_p7 = scmp.lt.s32.totalorder %s687_s30, %s968_s2 }
  0x2d   : > { %p689_p4 = scmp.ne.s32.totalorder %s687_s30, %s688_s8  ;;  %p694_p8 = scmp.lt.s32.totalorder %s692_s9, %s688_s8 }
  0x2f   : > { %p690_p5 = pnand %p689_p4, %p863_p9  ;;  %p695_p10 = por %p694_p8, %p693_p7 }
  0x31   : > { %p691_p6 = pneg %p690_p5 }
  0x33   : > { %p696_p13 = pnand %p695_p10, %p691_p6 }
  0x35   : > { %699 = shalt.err (!%p696_p13)
}
  0x36   : > { %543 = dma.vmem_to_hbm [thread:$0]  (%p863_p9), %s359_s4, 128, %s361_s5, %s339_s29  }
  0x37   : > { %s344_s18 = scalar_lea.sflag [#allocation9], %s889_s22  ;;  %s714_s19 = sshra.s32 %s915_s7, 4  ;;  %s715_s19 = int_to_ptr.hbm [resolvable:$true] %s714_s19 }
  0x38   : > { %s716_s21 = scalar_lea.hbm %s715_s19, 8  ;;  %s720_s30 = scalar_lea.hbm %s969_s3, 16 }
  0x39   : > { %p717_p0 = scmp.ne.s32.totalorder %s715_s19, %s716_s21  ;;  %p721_p3 = scmp.lt.s32.totalorder %s715_s19, %s969_s3 }
  0x3a   : > { %p722_p4 = scmp.lt.s32.totalorder %s720_s30, %s716_s21 }
  0x3b   : > { %p718_p1 = pnand %p717_p0, %p863_p9 }
  0x3c   : > { %p723_p5 = por %p722_p4, %p721_p3 }
  0x3d   : > { %p719_p2 = pneg %p718_p1 }
  0x3f   : > { %p724_p6 = pnand %p723_p5, %p719_p2 }
  0x41   : > { %727 = shalt.err (!%p724_p6)
}
  0x42   : > { %544 = dma.vmem_to_hbm [thread:$0]  (%p863_p9), %s375_s24, 128, %s915_s7, %s344_s18  }
  0x43 PF: > { %s388_s22 = sand.u32 1, %s770_s12   ;;  %p555_p7 = pnand %p523_p12, %p870_p11 }
  0x44   : > { %s389_s4 = scalar_lea.sflag [#allocation4], %s388_s22 }
  0x45   : > { %p556_p8 = pneg %p555_p7 }
  0x47   : > { %761 = dma.done.wait (%p556_p8), %s389_s4, 128  }
  0x48   : > { %763 = vsyncadd (%p556_p8), %s389_s4, 4294967168  ;;  %s399_s5 = scalar_lea.sflag [#allocation9], %s388_s22 }
  0x49   : > { %765 = dma.done.wait (%p556_p8), %s399_s5, 128  }
  0x4a   : > { %767 = vsyncadd (%p556_p8), %s399_s5, 4294967168  ;;  %s26_s17 = sadd.s32 1, %s790_s17   ;;  %s974_s12 = smov %s774_s13 }
  0x4b   : > { %p23_p10 = scmp.ge.s32.totalorder %s26_s17, 4   ;;  %s975_s13 = smov %s778_s14 }
  0x4c   : > { %s976_s14 = smov %s868_s26  ;;  %s977_s15 = smov %s786_s16 }
  0x4d   : > { %s978_s16 = smov %s980_s20  ;;  %25 = sbr.rel (!%p23_p10) target bundleno = 10 (0xa), region = 115 }
  0x52   :  { %405 = vsyncpa [#allocation3], 1 }
  0x53   :  { %407 = vsyncpa [#allocation3 + $0x1], 1 }
  0x54   :  { %408 = vsyncpa [#allocation6], 1 }
  0x55   :  { %410 = vsyncpa [#allocation6 + $0x1], 1 }
  0x56   :  { %411 = vsyncpa [#allocation4], 1 }
  0x57   :  { %413 = vsyncpa [#allocation4 + $0x1], 1 }
  0x58   :  { %414 = vsyncpa [#allocation9], 1 }
  0x59   :  { %416 = vsyncpa [#allocation9 + $0x1], 1 }

</bundles_post_ra>
